<compile_context>
chip_gen: v6e
topology: v6e:2x2x1
jax: 0.10.0
libtpu: 0.0.40
codegen_flags: <defaults>
</compile_context>

<pallas_src>
import jax
import jax.numpy as jnp
import numpy as np
from jax.experimental import pallas as pl
from jax.experimental.pallas import tpu as pltpu


HIDDEN = 256
LANE = 128


def _round_up(x, m):
    return ((x + m - 1) // m) * m


def _policy_kernel(s_ref, g_ref,
                   w1a_ref, w1b_ref, b1_ref,
                   w2_ref, b2_ref,
                   w3_ref, b3_ref,
                   out_ref):
    # Layer 1: cat(states, goals) @ W1 == states @ W1[:S] + goals @ W1[S:]
    h1 = (jnp.dot(s_ref[...], w1a_ref[...], preferred_element_type=jnp.float32)
          + jnp.dot(g_ref[...], w1b_ref[...], preferred_element_type=jnp.float32)
          + b1_ref[...])
    h1 = jnp.maximum(h1, 0.0)                      # f32 epilogue (v5e-safe)
    h1 = h1.astype(w2_ref.dtype)                   # bf16 feed if enabled

    # Layer 2 (FLOP-dominant 256x256 dot)
    h2 = jnp.dot(h1, w2_ref[...], preferred_element_type=jnp.float32) + b2_ref[...]
    h2 = jnp.maximum(h2, 0.0)
    h2 = h2.astype(w3_ref.dtype)

    # Layer 3 (no activation); output padded to a lane-dense 128-wide slab
    out = jnp.dot(h2, w3_ref[...], preferred_element_type=jnp.float32) + b3_ref[...]
    out_ref[...] = out.astype(out_ref.dtype)


def policy_forward(states, goals, params, *, tile_b=512,
                   compute_dtype=jnp.float32):
    """states, goals: (B, state_size) float32. Returns logits (B, output_size) f32."""
    w1, b1, w2, b2, w3, b3 = params
    B, state_size = states.shape
    hidden = w1.shape[1]
    out_size = w3.shape[1]

    # --- wrapper-side layout plumbing ------------------------------------
    # Split W1 so the kernel never concatenates along the lane axis.
    w1a = w1[:state_size, :]
    w1b = w1[state_size:, :]

    # Pad output feature dim to a multiple of 128 lanes (unmasked stores).
    out_pad = _round_up(max(out_size, LANE), LANE)
    w3p = jnp.zeros((hidden, out_pad), w3.dtype).at[:, :out_size].set(w3)
    b3p = jnp.zeros((1, out_pad), b3.dtype).at[:, :out_size].set(b3)

    # Optional bf16 MXU inputs (accumulation stays f32 in the kernel).
    cast = lambda a: a.astype(compute_dtype)
    w1a_c, w1b_c, w2_c, w3_c = cast(w1a), cast(w1b), cast(w2), cast(w3p)
    states_c, goals_c = cast(states), cast(goals)
    # Biases stay f32 (added after the f32-accumulated dot).

    # Batch tiling (pad ragged tail with zero rows).
    tile = min(tile_b, _round_up(B, 8))
    b_pad = _round_up(B, tile)
    if b_pad != B:
        pad = ((0, b_pad - B), (0, 0))
        states_c = jnp.pad(states_c, pad)
        goals_c = jnp.pad(goals_c, pad)
    grid = (b_pad // tile,)

    batch_spec = lambda f: pl.BlockSpec((tile, f), lambda i: (i, 0))
    const_spec = lambda r, c: pl.BlockSpec((r, c), lambda i: (0, 0))

    out_padded = pl.pallas_call(
        _policy_kernel,
        out_shape=jax.ShapeDtypeStruct((b_pad, out_pad), jnp.float32),
        grid=grid,
        in_specs=[
            batch_spec(state_size),            # states tile
            batch_spec(state_size),            # goals tile
            const_spec(state_size, hidden),    # w1a (resident)
            const_spec(state_size, hidden),    # w1b (resident)
            const_spec(1, hidden),             # b1
            const_spec(hidden, hidden),        # w2
            const_spec(1, hidden),             # b2
            const_spec(hidden, out_pad),       # w3 (padded)
            const_spec(1, out_pad),            # b3 (padded)
        ],
        out_specs=batch_spec(out_pad),
        compiler_params=pltpu.CompilerParams(
            dimension_semantics=("parallel",),
            vmem_limit_bytes=32 * 1024 * 1024,
        ),
    )(states_c, goals_c, w1a_c, w1b_c, b1, w2_c, b2, w3_c, b3p)

    return out_padded[:B, :out_size]


def init_params(key, state_size, output_size):
    """Deterministic init matching PolicyNetwork.weight_init:
    weights ~ N(0, sqrt(2/(fan_in+fan_out))); biases ~ PyTorch default
    U(-1/sqrt(fan_in), 1/sqrt(fan_in)). Weights stored as (in, out)."""
    def linear(k, fan_in, fan_out):
        kw, kb = jax.random.split(k)
        std = np.sqrt(2.0 / (fan_in + fan_out))
        w = std * jax.random.normal(kw, (fan_in, fan_out), dtype=jnp.float32)
        bound = 1.0 / np.sqrt(fan_in)
        b = jax.random.uniform(kb, (1, fan_out), dtype=jnp.float32,
                               minval=-bound, maxval=bound)
        return w, b

    k1, k2, k3 = jax.random.split(key, 3)
    w1, b1 = linear(k1, state_size * 2, HIDDEN)
    w2, b2 = linear(k2, HIDDEN, HIDDEN)
    w3, b3 = linear(k3, HIDDEN, output_size)
    return (w1, b1, w2, b2, w3, b3)


def policy_forward_ref(states, goals, params):
    """Pure-JAX reference for correctness check."""
    w1, b1, w2, b2, w3, b3 = params
    joint = jnp.concatenate([states, goals], axis=1)
    x = jnp.maximum(joint @ w1 + b1, 0.0)
    x = jnp.maximum(x @ w2 + b2, 0.0)
    return x @ w3 + b3


if __name__ == "__main__":
    key = jax.random.PRNGKey(0)
    k_params, k_s, k_g = jax.random.split(key, 3)

    batch = 2
    state_size = 16
    output_size = 8

    params = init_params(k_params, state_size, output_size)
    states = jax.random.normal(k_s, (batch, state_size), dtype=jnp.float32)
    goals = jax.random.normal(k_g, (batch, state_size), dtype=jnp.float32)

    ref = policy_forward_ref(states, goals, params)

    # f32 path — tight tolerance.
    logits = policy_forward(states, goals, params)
    jax.block_until_ready(logits)
    np.testing.assert_allclose(np.asarray(logits), np.asarray(ref),
                               rtol=1e-5, atol=1e-5)

    # bf16 MXU path (f32 accumulation) — loosened tolerance.
    logits_bf16 = policy_forward(states, goals, params,
                                 compute_dtype=jnp.bfloat16)
    jax.block_until_ready(logits_bf16)
    np.testing.assert_allclose(np.asarray(logits_bf16), np.asarray(ref),
                               rtol=5e-2, atol=5e-2)

    print("KERNEL_OK")
</pallas_src>

<mosaic_0001>
module attributes {stable_mosaic.version = 11 : i64} {
  func.func @_policy_kernel(%arg0: i32, %arg1: memref<8x16xf32, #tpu.memory_space<vmem>>, %arg2: memref<8x16xf32, #tpu.memory_space<vmem>>, %arg3: memref<16x256xf32, #tpu.memory_space<vmem>>, %arg4: memref<16x256xf32, #tpu.memory_space<vmem>>, %arg5: memref<1x256xf32, #tpu.memory_space<vmem>>, %arg6: memref<256x256xf32, #tpu.memory_space<vmem>>, %arg7: memref<1x256xf32, #tpu.memory_space<vmem>>, %arg8: memref<256x128xf32, #tpu.memory_space<vmem>>, %arg9: memref<1x128xf32, #tpu.memory_space<vmem>>, %arg10: memref<8x128xf32, #tpu.memory_space<vmem>>) attributes {dimension_semantics = [#tpu.dimension_semantics<parallel>], iteration_bounds = array<i64: 1>, scalar_prefetch = 0 : i64, scratch_operands = 0 : i64, tpu.core_type = #tpu.core_type<tc>, window_params = [{transform_indices = @transform_0, window_bounds = array<i64: 8, 16>}, {transform_indices = @transform_1, window_bounds = array<i64: 8, 16>}, {pipeline_mode = #tpu.pipeline_mode<synchronous>, transform_indices = @transform_2, window_bounds = array<i64: 16, 256>}, {pipeline_mode = #tpu.pipeline_mode<synchronous>, transform_indices = @transform_3, window_bounds = array<i64: 16, 256>}, {pipeline_mode = #tpu.pipeline_mode<synchronous>, transform_indices = @transform_4, window_bounds = array<i64: 1, 256>}, {pipeline_mode = #tpu.pipeline_mode<synchronous>, transform_indices = @transform_5, window_bounds = array<i64: 256, 256>}, {pipeline_mode = #tpu.pipeline_mode<synchronous>, transform_indices = @transform_6, window_bounds = array<i64: 1, 256>}, {pipeline_mode = #tpu.pipeline_mode<synchronous>, transform_indices = @transform_7, window_bounds = array<i64: 256, 128>}, {pipeline_mode = #tpu.pipeline_mode<synchronous>, transform_indices = @transform_8, window_bounds = array<i64: 1, 128>}, {transform_indices = @transform_9, window_bounds = array<i64: 8, 128>}]} {
    %c0 = arith.constant 0 : index
    %c0_0 = arith.constant 0 : index
    %0 = vector.load %arg1[%c0, %c0_0] : memref<8x16xf32, #tpu.memory_space<vmem>>, vector<8x16xf32>
    %c0_1 = arith.constant 0 : index
    %c0_2 = arith.constant 0 : index
    %1 = vector.load %arg3[%c0_1, %c0_2] : memref<16x256xf32, #tpu.memory_space<vmem>>, vector<16x256xf32>
    %cst = arith.constant dense<0.000000e+00> : vector<8x256xf32>
    %2 = tpu.matmul %0, %1, %cst {dimension_numbers = #tpu.dot_dimension_numbers<[1], [0], [0], [1], [0, 0, 1, 1], [], []>} : vector<8x16xf32>, vector<16x256xf32>, vector<8x256xf32> -> vector<8x256xf32>
    %c0_3 = arith.constant 0 : index
    %c0_4 = arith.constant 0 : index
    %3 = vector.load %arg2[%c0_3, %c0_4] : memref<8x16xf32, #tpu.memory_space<vmem>>, vector<8x16xf32>
    %c0_5 = arith.constant 0 : index
    %c0_6 = arith.constant 0 : index
    %4 = vector.load %arg4[%c0_5, %c0_6] : memref<16x256xf32, #tpu.memory_space<vmem>>, vector<16x256xf32>
    %cst_7 = arith.constant dense<0.000000e+00> : vector<8x256xf32>
    %5 = tpu.matmul %3, %4, %cst_7 {dimension_numbers = #tpu.dot_dimension_numbers<[1], [0], [0], [1], [0, 0, 1, 1], [], []>} : vector<8x16xf32>, vector<16x256xf32>, vector<8x256xf32> -> vector<8x256xf32>
    %6 = arith.addf %2, %5 : vector<8x256xf32>
    %c0_8 = arith.constant 0 : index
    %c0_9 = arith.constant 0 : index
    %7 = vector.load %arg5[%c0_8, %c0_9] : memref<1x256xf32, #tpu.memory_space<vmem>>, vector<1x256xf32>
    %8 = vector.broadcast %7 : vector<1x256xf32> to vector<8x256xf32>
    %9 = arith.addf %6, %8 : vector<8x256xf32>
    %cst_10 = arith.constant 0.000000e+00 : f32
    %10 = vector.broadcast %cst_10 : f32 to vector<8x256xf32>
    %11 = arith.maximumf %9, %10 : vector<8x256xf32>
    %c0_11 = arith.constant 0 : index
    %c0_12 = arith.constant 0 : index
    %12 = vector.load %arg6[%c0_11, %c0_12] : memref<256x256xf32, #tpu.memory_space<vmem>>, vector<256x256xf32>
    %cst_13 = arith.constant dense<0.000000e+00> : vector<8x256xf32>
    %13 = tpu.matmul %11, %12, %cst_13 {dimension_numbers = #tpu.dot_dimension_numbers<[1], [0], [0], [1], [0, 0, 1, 1], [], []>} : vector<8x256xf32>, vector<256x256xf32>, vector<8x256xf32> -> vector<8x256xf32>
    %c0_14 = arith.constant 0 : index
    %c0_15 = arith.constant 0 : index
    %14 = vector.load %arg7[%c0_14, %c0_15] : memref<1x256xf32, #tpu.memory_space<vmem>>, vector<1x256xf32>
    %15 = vector.broadcast %14 : vector<1x256xf32> to vector<8x256xf32>
    %16 = arith.addf %13, %15 : vector<8x256xf32>
    %cst_16 = arith.constant 0.000000e+00 : f32
    %17 = vector.broadcast %cst_16 : f32 to vector<8x256xf32>
    %18 = arith.maximumf %16, %17 : vector<8x256xf32>
    %c0_17 = arith.constant 0 : index
    %c0_18 = arith.constant 0 : index
    %19 = vector.load %arg8[%c0_17, %c0_18] : memref<256x128xf32, #tpu.memory_space<vmem>>, vector<256x128xf32>
    %cst_19 = arith.constant dense<0.000000e+00> : vector<8x128xf32>
    %20 = tpu.matmul %18, %19, %cst_19 {dimension_numbers = #tpu.dot_dimension_numbers<[1], [0], [0], [1], [0, 0, 1, 1], [], []>} : vector<8x256xf32>, vector<256x128xf32>, vector<8x128xf32> -> vector<8x128xf32>
    %c0_20 = arith.constant 0 : index
    %c0_21 = arith.constant 0 : index
    %21 = vector.load %arg9[%c0_20, %c0_21] : memref<1x128xf32, #tpu.memory_space<vmem>>, vector<1x128xf32>
    %22 = vector.broadcast %21 : vector<1x128xf32> to vector<8x128xf32>
    %23 = arith.addf %20, %22 : vector<8x128xf32>
    %c0_22 = arith.constant 0 : index
    %c0_23 = arith.constant 0 : index
    %24 = vector.load %arg10[%c0_22, %c0_23] : memref<8x128xf32, #tpu.memory_space<vmem>>, vector<8x128xf32>
    tpu.vector_store %arg10[%c0_22, %c0_23], %23 {strides = array<i32>} : memref<8x128xf32, #tpu.memory_space<vmem>>, vector<8x128xf32>,
    return
  }
  func.func @transform_0(%arg0: i32) -> (i32, i32) {
    %c0_i32 = arith.constant 0 : i32
    %c0_i32_0 = arith.constant 0 : i32
    return %arg0, %c0_i32 : i32, i32
  }
  func.func @transform_1(%arg0: i32) -> (i32, i32) {
    %c0_i32 = arith.constant 0 : i32
    %c0_i32_0 = arith.constant 0 : i32
    return %arg0, %c0_i32 : i32, i32
  }
  func.func @transform_2(%arg0: i32) -> (i32, i32) {
    %c0_i32 = arith.constant 0 : i32
    %c0_i32_0 = arith.constant 0 : i32
    %c0_i32_1 = arith.constant 0 : i32
    return %c0_i32, %c0_i32_0 : i32, i32
  }
  func.func @transform_3(%arg0: i32) -> (i32, i32) {
    %c0_i32 = arith.constant 0 : i32
    %c0_i32_0 = arith.constant 0 : i32
    %c0_i32_1 = arith.constant 0 : i32
    return %c0_i32, %c0_i32_0 : i32, i32
  }
  func.func @transform_4(%arg0: i32) -> (i32, i32) {
    %c0_i32 = arith.constant 0 : i32
    %c0_i32_0 = arith.constant 0 : i32
    %c0_i32_1 = arith.constant 0 : i32
    return %c0_i32, %c0_i32_0 : i32, i32
  }
  func.func @transform_5(%arg0: i32) -> (i32, i32) {
    %c0_i32 = arith.constant 0 : i32
    %c0_i32_0 = arith.constant 0 : i32
    %c0_i32_1 = arith.constant 0 : i32
    return %c0_i32, %c0_i32_0 : i32, i32
  }
  func.func @transform_6(%arg0: i32) -> (i32, i32) {
    %c0_i32 = arith.constant 0 : i32
    %c0_i32_0 = arith.constant 0 : i32
    %c0_i32_1 = arith.constant 0 : i32
    return %c0_i32, %c0_i32_0 : i32, i32
  }
  func.func @transform_7(%arg0: i32) -> (i32, i32) {
    %c0_i32 = arith.constant 0 : i32
    %c0_i32_0 = arith.constant 0 : i32
    %c0_i32_1 = arith.constant 0 : i32
    return %c0_i32, %c0_i32_0 : i32, i32
  }
  func.func @transform_8(%arg0: i32) -> (i32, i32) {
    %c0_i32 = arith.constant 0 : i32
    %c0_i32_0 = arith.constant 0 : i32
    %c0_i32_1 = arith.constant 0 : i32
    return %c0_i32, %c0_i32_0 : i32, i32
  }
  func.func @transform_9(%arg0: i32) -> (i32, i32) {
    %c0_i32 = arith.constant 0 : i32
    %c0_i32_0 = arith.constant 0 : i32
    return %arg0, %c0_i32 : i32, i32
  }
}

</mosaic_0001>

<bundles_post_ra>
// kernel: tpu_custom_call.1
= control target key start
LH: loop header
LB: loop body
LE: loop exit
PB: predicated region body
PF: predicated region fallthrough
CT: control target
= control target key end

     0   :  { %14 = vsyncpa [#allocation3], 0  ;;  %s866_s0 = inlined_call_operand.hbm [shape: f32[8,16], index: 0, kind: input, shape index: {}]   ;;  %s867_s1 = inlined_call_operand.hbm [shape: f32[8,16], index: 1, kind: input, shape index: {}]   ;;  %s868_s2 = inlined_call_operand.hbm [shape: f32[16,256], index: 2, kind: input, shape index: {}]   ;;  %s869_s3 = inlined_call_operand.hbm [shape: f32[16,256], index: 3, kind: input, shape index: {}]   ;;  %s870_s4 = inlined_call_operand.vmem [shape: f32[1,256], index: 4, kind: input, shape index: {}]   ;;  %s871_s5 = inlined_call_operand.hbm [shape: f32[256,256], index: 5, kind: input, shape index: {}]   ;;  %s872_s6 = inlined_call_operand.vmem [shape: f32[1,256], index: 6, kind: input, shape index: {}]   ;;  %s873_s7 = inlined_call_operand.hbm [shape: f32[256,128], index: 7, kind: input, shape index: {}]   ;;  %s874_s8 = inlined_call_operand.vmem [shape: f32[1,128], index: 8, kind: input, shape index: {}]   ;;  %s875_s9 = inlined_call_operand.hbm [shape: f32[8,128], index: 9, kind: output, shape index: {}]  }
   0x1   :  { %15 = vsyncpa [#allocation6], 0 }
   0x2   :  { %16 = vsyncpa [#allocation9], 0 }
   0x3   :  { %17 = vsyncpa [#allocation12], 0 }
   0x4   :  { %18 = vsyncpa [#allocation4], 0  ;;  %s763_s30 = smov [#allocation5]  }
   0x5   :  { %s35_s10 = sshll.u32 %s763_s30, 4  ;;  %s36_s10 = int_to_ptr.vmem [resolvable:$true] %s35_s10 }
   0x6   :  { %s621_s11 = scalar_lea.vmem %s36_s10, 128  ;;  %p626_p1 = scmp.lt.s32.totalorder %s36_s10, %s36_s10 }
   0x7   :  { %p622_p0 = scmp.ne.s32.totalorder %s36_s10, %s621_s11  ;;  %p627_p2 = scmp.lt.s32.totalorder %s621_s11, %s621_s11 }
   0x9   :  { %p628_p3 = por %p627_p2, %p626_p1 }
   0xb   :  { %p629_p4 = pnand %p628_p3, %p622_p0 }
   0xd   :  { %632 = shalt.err (!%p629_p4)
}
   0xe   :  { %38 = dma.hbm_to_vmem [thread:$0]  %s867_s1, 128, %s36_s10, [#allocation6]  }
   0xf   :  { %s764_s14 = smov [#allocation8]   ;;  %s765_s16 = smov [#allocation2]  }
  0x10   :  { %s56_s15 = sshll.u32 %s764_s14, 4  ;;  %s25_s17 = sshll.u32 %s765_s16, 4  ;;  %s57_s15 = int_to_ptr.vmem [resolvable:$true] %s56_s15  ;;  %s26_s17 = int_to_ptr.vmem [resolvable:$true] %s25_s17 }
  0x11   :  { %s641_s18 = scalar_lea.vmem %s57_s15, 512  ;;  %p646_p6 = scmp.lt.s32.totalorder %s57_s15, %s57_s15 }
  0x12   :  { %p642_p5 = scmp.ne.s32.totalorder %s57_s15, %s641_s18  ;;  %p647_p7 = scmp.lt.s32.totalorder %s641_s18, %s641_s18 }
  0x14   :  { %p648_p8 = por %p647_p7, %p646_p6 }
  0x16   :  { %p649_p9 = pnand %p648_p8, %p642_p5 }
  0x18   :  { %652 = shalt.err (!%p649_p9)
}
  0x19   :  { %s766_s19 = smov 256   ;;  %s767_s20 = smov 16  }
  0x1a   :  { %62 = dma.hbm_to_vmem [thread:$0]  %s869_s3, 512, %s57_s15, [#allocation9], %s766_s19, %s766_s19, %s767_s20  }
  0x1b   :  { %s661_s1 = scalar_lea.vmem %s26_s17, 128  ;;  %p666_p11 = scmp.lt.s32.totalorder %s26_s17, %s26_s17 }
  0x1c   :  { %p662_p10 = scmp.ne.s32.totalorder %s26_s17, %s661_s1  ;;  %p667_p12 = scmp.lt.s32.totalorder %s661_s1, %s661_s1 }
  0x1e   :  { %p668_p13 = por %p667_p12, %p666_p11 }
  0x20   :  { %p669_p0 = pnand %p668_p13, %p662_p10 }
  0x22   :  { %672 = shalt.err (!%p669_p0)
}
  0x23   :  { %28 = dma.hbm_to_vmem [thread:$0]  %s866_s0, 128, %s26_s17, [#allocation3]  }
  0x24   :  { %s768_s25 = smov [#allocation7]   ;;  %s769_s27 = smov [#allocation10]  }
  0x25   :  { %s44_s26 = sshll.u32 %s768_s25, 4  ;;  %s70_s28 = sshll.u32 %s769_s27, 4  ;;  %s45_s26 = int_to_ptr.vmem [resolvable:$true] %s44_s26  ;;  %s71_s28 = int_to_ptr.vmem [resolvable:$true] %s70_s28 }
  0x26   :  { %s681_s29 = scalar_lea.vmem %s45_s26, 512  ;;  %p686_p2 = scmp.lt.s32.totalorder %s45_s26, %s45_s26 }
  0x27   :  { %p682_p1 = scmp.ne.s32.totalorder %s45_s26, %s681_s29  ;;  %p687_p3 = scmp.lt.s32.totalorder %s681_s29, %s681_s29 }
  0x29   :  { %p688_p4 = por %p687_p3, %p686_p2 }
  0x2b   :  { %p689_p5 = pnand %p688_p4, %p682_p1 }
  0x2d   :  { %692 = shalt.err (!%p689_p5)
}
  0x2e   :  { %50 = dma.hbm_to_vmem [thread:$0]  %s868_s2, 512, %s45_s26, [#allocation6], %s766_s19, %s766_s19, %s767_s20  }
  0x2f   :  { %s701_s0 = scalar_lea.vmem %s71_s28, 8192  ;;  %p706_p7 = scmp.lt.s32.totalorder %s71_s28, %s71_s28 }
  0x30   :  { %p702_p6 = scmp.ne.s32.totalorder %s71_s28, %s701_s0  ;;  %p707_p8 = scmp.lt.s32.totalorder %s701_s0, %s701_s0 }
  0x32   :  { %p708_p9 = por %p707_p8, %p706_p7 }
  0x34   :  { %p709_p10 = pnand %p708_p9, %p702_p6 }
  0x36   :  { %712 = shalt.err (!%p709_p10)
}
  0x37   :  { %76 = dma.hbm_to_vmem [thread:$0]  %s871_s5, 8192, %s71_s28, [#allocation9], %s766_s19, %s766_s19, %s767_s20  }
  0x38   :  { %s770_s12 = smov [#allocation11]  }
  0x39   :  { %s84_s13 = sshll.u32 %s770_s12, 4  ;;  %s85_s13 = int_to_ptr.vmem [resolvable:$true] %s84_s13 }
  0x3a   :  { %s721_s14 = scalar_lea.vmem %s85_s13, 4096  ;;  %p726_p12 = scmp.lt.s32.totalorder %s85_s13, %s85_s13 }
  0x3b   :  { %p722_p11 = scmp.ne.s32.totalorder %s85_s13, %s721_s14  ;;  %p727_p13 = scmp.lt.s32.totalorder %s721_s14, %s721_s14 }
  0x3d   :  { %p728_p0 = por %p727_p13, %p726_p12 }
  0x3f   :  { %p729_p1 = pnand %p728_p0, %p722_p11 }
  0x41   :  { %732 = shalt.err (!%p729_p1)
}
  0x42   :  { %s771_s2 = smov 128   ;;  %s772_s15 = smov 8  }
  0x43   :  { %90 = dma.hbm_to_vmem [thread:$0]  %s873_s7, 4096, %s85_s13, [#allocation12], %s771_s2, %s771_s2, %s772_s15  }
  0x44   :  { %753 = dma.done.wait [#allocation3], 128  }
  0x45   :  { %754 = vsyncadd [#allocation3], 4294967168 }
  0x46   :  { %755 = dma.done.wait [#allocation6], 640  }
  0x47   :  { %756 = vsyncadd [#allocation6], 4294966656 }
  0x48   :  { %757 = dma.done.wait [#allocation9], 8704  }
  0x49   :  { %758 = vsyncadd [#allocation9], 4294958592 }
  0x4a   :  { %759 = dma.done.wait [#allocation12], 4096  }
  0x4b   :  { %760 = vsyncadd [#allocation12], 4294963200  ;;  %v773_v0 = vmov 0.0   ;;  %v120_v1 = vld [vmem:[#allocation8 + $0x18] sm:$0xff]  ;;  %v119_v2 = vld [vmem:[#allocation8 + $0x10] sm:$0xff]  ;;  %vm121_vm0 = vcmask 130048  }
  0x4c   :  { %189 = vmatprep.mubr.f32.mxu1 %v773_v0  ;;  %v118_v3 = vld [vmem:[#allocation8 + $0x8] sm:$0xff]  ;;  %153 = vmatprep.subr.mxu1 %v120_v1  ;;  %v117_v4 = vld [vmem:[#allocation8] sm:$0xff]  ;;  %v116_v5 = vld [vmem:[#allocation5] sm:$0xff]  ;;  %s774_s21 = smov [#allocation13]  }
  0x4d   :  { %154 = vmatpush1.msra.mxu1 %v119_v2  ;;  %v115_v6 = vld [vmem:[#allocation7 + $0x18] sm:$0xff]  ;;  %v114_v7 = vld [vmem:[#allocation7 + $0x10] sm:$0xff]  ;;  %v113_v9 = vld [vmem:[#allocation7 + $0x8] sm:$0xff]  ;;  %s551_s22 = sshll.u32 %s774_s21, 4  ;;  %s552_s22 = int_to_ptr.vmem [resolvable:$true] %s551_s22 }
  0x4e   :  { %155 = vmatprep.subr.mxu1 %v118_v3  ;;  %v317_v8 = vld [vmem:[#allocation10 + $0xf8] sm:$0xff]  ;;  %v316_v10 = vld [vmem:[#allocation10 + $0xf0] sm:$0xff]  ;;  %v112_v11 = vld [vmem:[#allocation7] sm:$0xff]  ;;  %p738_p3 = scmp.lt.s32.totalorder %s552_s22, %s552_s22 }
  0x4f   :  { %156 = vmatpush1.msra.mxu1 %v117_v4  ;;  %362 = vmatprep.subr.mxu0 %v317_v8  ;;  %v315_v12 = vld [vmem:[#allocation10 + $0xe8] sm:$0xff]  ;;  %v111_v13 = vld [vmem:[#allocation2] sm:$0xff]  ;;  %v314_v14 = vld [vmem:[#allocation10 + $0xe0] sm:$0xff] }
  0x50   :  { %563 = vmatmul.mubr.msk.f32.vlgmr.msra.gmra.mxu1 %vm121_vm0, %v116_v5  ;;  %227 = vmatprep.subr.mxu1 %v115_v6  ;;  %v313_v15 = vld [vmem:[#allocation10 + $0xd8] sm:$0xff]  ;;  %v312_v16 = vld [vmem:[#allocation10 + $0xd0] sm:$0xff]  ;;  %v311_v17 = vld [vmem:[#allocation10 + $0xc8] sm:$0xff] }
  0x51   :  { %228 = vmatpush1.msra.mxu1 %v114_v7  ;;  %263 = vmatprep.mubr.f32.mxu1 %v773_v0  ;;  %v310_v18 = vld [vmem:[#allocation10 + $0xc0] sm:$0xff]  ;;  %v309_v19 = vld [vmem:[#allocation10 + $0xb8] sm:$0xff]  ;;  %v308_v20 = vld [vmem:[#allocation10 + $0xb0] sm:$0xff] }
  0x52   :  { %229 = vmatprep.subr.mxu1 %v113_v9  ;;  %363 = vmatpush1.msra.mxu0 %v316_v10  ;;  %v307_v21 = vld [vmem:[#allocation10 + $0xa8] sm:$0xff]  ;;  %v306_v22 = vld [vmem:[#allocation10 + $0xa0] sm:$0xff]  ;;  %v305_v23 = vld [vmem:[#allocation10 + $0x98] sm:$0xff] }
  0x53   :  { %230 = vmatpush1.msra.mxu1 %v112_v11  ;;  %364 = vmatprep.subr.mxu0 %v315_v12  ;;  %v304_v24 = vld [vmem:[#allocation10 + $0x90] sm:$0xff]  ;;  %v303_v25 = vld [vmem:[#allocation10 + $0x88] sm:$0xff]  ;;  %v302_v26 = vld [vmem:[#allocation10 + $0x80] sm:$0xff] }
  0x54   :  { %564 = vmatmul.mubr.msk.f32.vlgmr.msra.gmra.mxu1 %vm121_vm0, %v111_v13  ;;  %365 = vmatpush1.msra.mxu0 %v314_v14  ;;  %v301_v27 = vld [vmem:[#allocation10 + $0x78] sm:$0xff]  ;;  %v300_v28 = vld [vmem:[#allocation10 + $0x70] sm:$0xff]  ;;  %v299_v29 = vld [vmem:[#allocation10 + $0x68] sm:$0xff] }
  0x55   :  { %366 = vmatprep.subr.mxu0 %v313_v15  ;;  %v298_v30 = vld [vmem:[#allocation10 + $0x60] sm:$0xff]  ;;  %v297_v31 = vld [vmem:[#allocation10 + $0x58] sm:$0xff]  ;;  %v296_v32 = vld [vmem:[#allocation10 + $0x50] sm:$0xff] }
  0x56   :  { %367 = vmatpush1.msra.mxu0 %v312_v16  ;;  %v295_v33 = vld [vmem:[#allocation10 + $0x48] sm:$0xff]  ;;  %v294_v34 = vld [vmem:[#allocation10 + $0x40] sm:$0xff]  ;;  %v293_v35 = vld [vmem:[#allocation10 + $0x38] sm:$0xff] }
  0x57   :  { %368 = vmatprep.subr.mxu0 %v311_v17  ;;  %v292_v36 = vld [vmem:[#allocation10 + $0x30] sm:$0xff]  ;;  %v291_v37 = vld [vmem:[#allocation10 + $0x28] sm:$0xff]  ;;  %v290_v38 = vld [vmem:[#allocation10 + $0x20] sm:$0xff] }
  0x58   :  { %369 = vmatpush1.msra.mxu0 %v310_v18  ;;  %v289_v39 = vld [vmem:[#allocation10 + $0x18] sm:$0xff]  ;;  %v288_v40 = vld [vmem:[#allocation10 + $0x10] sm:$0xff]  ;;  %v287_v41 = vld [vmem:[#allocation10 + $0x8] sm:$0xff] }
  0x59   :  { %370 = vmatprep.subr.mxu0 %v309_v19  ;;  %v286_v42 = vld [vmem:[#allocation10] sm:$0xff]  ;;  %v349_v43 = vld [vmem:[#allocation10 + $0x1f8] sm:$0xff]  ;;  %v348_v44 = vld [vmem:[#allocation10 + $0x1f0] sm:$0xff] }
  0x5a   :  { %371 = vmatpush1.msra.mxu0 %v308_v20  ;;  %v347_v45 = vld [vmem:[#allocation10 + $0x1e8] sm:$0xff]  ;;  %v346_v46 = vld [vmem:[#allocation10 + $0x1e0] sm:$0xff]  ;;  %v345_v47 = vld [vmem:[#allocation10 + $0x1d8] sm:$0xff] }
  0x5b   :  { %372 = vmatprep.subr.mxu0 %v307_v21  ;;  %v344_v48 = vld [vmem:[#allocation10 + $0x1d0] sm:$0xff]  ;;  %v343_v49 = vld [vmem:[#allocation10 + $0x1c8] sm:$0xff]  ;;  %v342_v50 = vld [vmem:[#allocation10 + $0x1c0] sm:$0xff] }
  0x5c   :  { %373 = vmatpush1.msra.mxu0 %v306_v22  ;;  %v341_v51 = vld [vmem:[#allocation10 + $0x1b8] sm:$0xff]  ;;  %v340_v52 = vld [vmem:[#allocation10 + $0x1b0] sm:$0xff]  ;;  %v339_v53 = vld [vmem:[#allocation10 + $0x1a8] sm:$0xff] }
  0x5d   :  { %374 = vmatprep.subr.mxu0 %v305_v23  ;;  %v338_v54 = vld [vmem:[#allocation10 + $0x1a0] sm:$0xff]  ;;  %v337_v55 = vld [vmem:[#allocation10 + $0x198] sm:$0xff]  ;;  %v336_v56 = vld [vmem:[#allocation10 + $0x190] sm:$0xff] }
  0x5e   :  { %375 = vmatpush1.msra.mxu0 %v304_v24  ;;  %v335_v57 = vld [vmem:[#allocation10 + $0x188] sm:$0xff]  ;;  %v334_v58 = vld [vmem:[#allocation10 + $0x180] sm:$0xff]  ;;  %v333_v59 = vld [vmem:[#allocation10 + $0x178] sm:$0xff] }
  0x5f   :  { %376 = vmatprep.subr.mxu0 %v303_v25  ;;  %v332_v60 = vld [vmem:[#allocation10 + $0x170] sm:$0xff]  ;;  %v331_v61 = vld [vmem:[#allocation10 + $0x168] sm:$0xff]  ;;  %v330_v62 = vld [vmem:[#allocation10 + $0x160] sm:$0xff] }
  0x60   :  { %377 = vmatpush1.msra.mxu0 %v302_v26  ;;  %v329_v63 = vld [vmem:[#allocation10 + $0x158] sm:$0xff]  ;;  %v328_v0 = vld [vmem:[#allocation10 + $0x150] sm:$0xff]  ;;  %v327_v1 = vld [vmem:[#allocation10 + $0x148] sm:$0xff] }
  0x61   :  { %378 = vmatprep.subr.mxu0 %v301_v27  ;;  %v326_v2 = vld [vmem:[#allocation10 + $0x140] sm:$0xff]  ;;  %v325_v3 = vld [vmem:[#allocation10 + $0x138] sm:$0xff]  ;;  %v324_v4 = vld [vmem:[#allocation10 + $0x130] sm:$0xff] }
  0x62   :  { %379 = vmatpush1.msra.mxu0 %v300_v28  ;;  %v323_v5 = vld [vmem:[#allocation10 + $0x128] sm:$0xff]  ;;  %v322_v6 = vld [vmem:[#allocation10 + $0x120] sm:$0xff]  ;;  %v321_v7 = vld [vmem:[#allocation10 + $0x118] sm:$0xff] }
  0x63   :  { %380 = vmatprep.subr.mxu0 %v299_v29  ;;  %v320_v8 = vld [vmem:[#allocation10 + $0x110] sm:$0xff]  ;;  %v319_v9 = vld [vmem:[#allocation10 + $0x108] sm:$0xff]  ;;  %v318_v10 = vld [vmem:[#allocation10 + $0x100] sm:$0xff] }
  0x64   :  { %381 = vmatpush1.msra.mxu0 %v298_v30  ;;  %v466_v11 = vld [vmem:[#allocation11 + $0xf8] sm:$0xff]  ;;  %v465_v13 = vld [vmem:[#allocation11 + $0xf0] sm:$0xff]  ;;  %v464_v15 = vld [vmem:[#allocation11 + $0xe8] sm:$0xff] }
  0x65   :  { %382 = vmatprep.subr.mxu0 %v297_v31  ;;  %v450_v12 = vld [vmem:[#allocation11 + $0x78] sm:$0xff]  ;;  %566 = vmatprep.subr.mxu1 %v466_v11  ;;  %v449_v14 = vld [vmem:[#allocation11 + $0x70] sm:$0xff]  ;;  %v448_v16 = vld [vmem:[#allocation11 + $0x68] sm:$0xff] }
  0x66   :  { %383 = vmatpush1.msra.mxu0 %v296_v32  ;;  %567 = vmatpush3.msra.mxu1 %v450_v12  ;;  %v463_v17 = vld [vmem:[#allocation11 + $0xe0] sm:$0xff]  ;;  %v462_v19 = vld [vmem:[#allocation11 + $0xd8] sm:$0xff]  ;;  %v461_v21 = vld [vmem:[#allocation11 + $0xd0] sm:$0xff] }
  0x67   :  { %384 = vmatprep.subr.mxu0 %v295_v33  ;;  %568 = vmatprep.subr.mxu1 %v465_v13  ;;  %v447_v18 = vld [vmem:[#allocation11 + $0x60] sm:$0xff]  ;;  %v446_v20 = vld [vmem:[#allocation11 + $0x58] sm:$0xff]  ;;  %v445_v22 = vld [vmem:[#allocation11 + $0x50] sm:$0xff] }
  0x68   :  { %385 = vmatpush1.msra.mxu0 %v294_v34  ;;  %569 = vmatpush3.msra.mxu1 %v449_v14  ;;  %v460_v23 = vld [vmem:[#allocation11 + $0xc8] sm:$0xff]  ;;  %v459_v25 = vld [vmem:[#allocation11 + $0xc0] sm:$0xff]  ;;  %v458_v27 = vld [vmem:[#allocation11 + $0xb8] sm:$0xff] }
  0x69   :  { %386 = vmatprep.subr.mxu0 %v293_v35  ;;  %570 = vmatprep.subr.mxu1 %v464_v15  ;;  %v444_v24 = vld [vmem:[#allocation11 + $0x48] sm:$0xff]  ;;  %v443_v26 = vld [vmem:[#allocation11 + $0x40] sm:$0xff]  ;;  %v442_v28 = vld [vmem:[#allocation11 + $0x38] sm:$0xff]  ;;  %v272_v35 = vlaneseq }
  0x6a   :  { %387 = vmatpush1.msra.mxu0 %v292_v36  ;;  %571 = vmatpush3.msra.mxu1 %v448_v16  ;;  %v457_v29 = vld [vmem:[#allocation11 + $0xb0] sm:$0xff]  ;;  %v456_v31 = vld [vmem:[#allocation11 + $0xa8] sm:$0xff]  ;;  %v455_v33 = vld [vmem:[#allocation11 + $0xa0] sm:$0xff] }
  0x6b   :  { %388 = vmatprep.subr.mxu0 %v291_v37  ;;  %572 = vmatprep.subr.mxu1 %v463_v17  ;;  %v441_v30 = vld [vmem:[#allocation11 + $0x30] sm:$0xff]  ;;  %v440_v32 = vld [vmem:[#allocation11 + $0x28] sm:$0xff]  ;;  %v439_v34 = vld [vmem:[#allocation11 + $0x20] sm:$0xff]  ;;  %v273_v36 = vshrl.u32 %v272_v35, 7 }
  0x6c   :  { %389 = vmatpush1.msra.mxu0 %v290_v38  ;;  %573 = vmatpush3.msra.mxu1 %v447_v18 }
  0x6d   :  { %390 = vmatprep.subr.mxu0 %v289_v39  ;;  %574 = vmatprep.subr.mxu1 %v462_v19  ;;  %v274_v38 = vsub.s32 0, %v273_v36  ;;  %v270_v39 = vld [vmem:[%s870_s4] sm:$0x3] }
  0x6e   :  { %391 = vmatpush1.msra.mxu0 %v288_v40  ;;  %575 = vmatpush3.msra.mxu1 %v446_v20  ;;  %v278_v40 = vsub.s32 1, %v273_v36 }
  0x6f   :  { %392 = vmatprep.subr.mxu0 %v287_v41  ;;  %576 = vmatprep.subr.mxu1 %v461_v21 }
  0x70   :  { %393 = vmatpush1.msra.mxu0 %v286_v42  ;;  %577 = vmatpush3.msra.mxu1 %v445_v22 }
  0x71   :  { %394 = vmatprep.subr.mxu0 %v349_v43  ;;  %578 = vmatprep.subr.mxu1 %v460_v23  ;;  %v275_v43 = vrot.slane %v270_v39, %v274_v38 }
  0x72   :  { %395 = vmatpush2.msra.mxu0 %v348_v44  ;;  %579 = vmatpush3.msra.mxu1 %v444_v24 }
  0x73   :  { %396 = vmatprep.subr.mxu0 %v347_v45  ;;  %580 = vmatprep.subr.mxu1 %v459_v25  ;;  %v279_v45 = vrot.slane %v270_v39, %v278_v40 }
  0x74   :  { %397 = vmatpush2.msra.mxu0 %v346_v46  ;;  %581 = vmatpush3.msra.mxu1 %v443_v26 }
  0x75   :  { %398 = vmatprep.subr.mxu0 %v345_v47  ;;  %582 = vmatprep.subr.mxu1 %v458_v27 }
  0x76   :  { %399 = vmatpush2.msra.mxu0 %v344_v48  ;;  %583 = vmatpush3.msra.mxu1 %v442_v28 }
  0x77   :  { %400 = vmatprep.subr.mxu0 %v343_v49  ;;  %584 = vmatprep.subr.mxu1 %v457_v29 }
  0x78   :  { %401 = vmatpush2.msra.mxu0 %v342_v50  ;;  %585 = vmatpush3.msra.mxu1 %v441_v30 }
  0x79   :  { %402 = vmatprep.subr.mxu0 %v341_v51  ;;  %586 = vmatprep.subr.mxu1 %v456_v31 }
  0x7a   :  { %403 = vmatpush2.msra.mxu0 %v340_v52  ;;  %587 = vmatpush3.msra.mxu1 %v440_v32  ;;  %v454_v52 = vld [vmem:[#allocation11 + $0x98] sm:$0xff] }
  0x7b   :  { %404 = vmatprep.subr.mxu0 %v339_v53  ;;  %588 = vmatprep.subr.mxu1 %v455_v33  ;;  %v438_v53 = vld [vmem:[#allocation11 + $0x18] sm:$0xff] }
  0x7c   :  { %405 = vmatpush2.msra.mxu0 %v338_v54  ;;  %589 = vmatpush3.msra.mxu1 %v439_v34  ;;  %v453_v54 = vld [vmem:[#allocation11 + $0x90] sm:$0xff] }
  0x7d   :  { %406 = vmatprep.subr.mxu0 %v337_v55  ;;  %590 = vmatprep.subr.mxu1 %v454_v52  ;;  %v437_v55 = vld [vmem:[#allocation11 + $0x10] sm:$0xff] }
  0x7e   :  { %407 = vmatpush2.msra.mxu0 %v336_v56  ;;  %591 = vmatpush3.msra.mxu1 %v438_v53  ;;  %v452_v56 = vld [vmem:[#allocation11 + $0x88] sm:$0xff] }
  0x7f   :  { %408 = vmatprep.subr.mxu0 %v335_v57  ;;  %592 = vmatprep.subr.mxu1 %v453_v54  ;;  %v436_v57 = vld [vmem:[#allocation11 + $0x8] sm:$0xff] }
  0x80   :  { %409 = vmatpush2.msra.mxu0 %v334_v58  ;;  %593 = vmatpush3.msra.mxu1 %v437_v55  ;;  %v451_v58 = vld [vmem:[#allocation11 + $0x80] sm:$0xff] }
  0x81   :  { %410 = vmatprep.subr.mxu0 %v333_v59  ;;  %594 = vmatprep.subr.mxu1 %v452_v56  ;;  %v435_v59 = vld [vmem:[#allocation11] sm:$0xff] }
  0x82   :  { %411 = vmatpush2.msra.mxu0 %v332_v60  ;;  %595 = vmatpush3.msra.mxu1 %v436_v57  ;;  %v350_v60 = vld [vmem:[%s872_s6] sm:$0x3]  ;;  %s733_s6 = scalar_lea.vmem %s552_s22, 128 }
  0x83   :  { %412 = vmatprep.subr.mxu0 %v331_v61  ;;  %596 = vmatprep.subr.mxu1 %v451_v58  ;;  %v355_v61 = vrot.slane %v350_v60, %v274_v38  ;;  %p734_p2 = scmp.ne.s32.totalorder %s552_s22, %s733_s6  ;;  %p739_p4 = scmp.lt.s32.totalorder %s733_s6, %s733_s6 }
  0x84   :  { %413 = vmatpush2.msra.mxu0 %v330_v62  ;;  %597 = vmatpush3.msra.mxu1 %v435_v59  ;;  %v359_v62 = vrot.slane %v350_v60, %v278_v40 }
  0x85   :  { %414 = vmatprep.subr.mxu0 %v329_v63  ;;  %p740_p5 = por %p739_p4, %p738_p3 }
  0x86   :  { %415 = vmatpush2.msra.mxu0 %v328_v0 }
  0x87   :  { %416 = vmatprep.subr.mxu0 %v327_v1  ;;  %p741_p6 = pnand %p740_p5, %p734_p2 }
  0x88   :  { %417 = vmatpush2.msra.mxu0 %v326_v2 }
  0x89   :  { %418 = vmatprep.subr.mxu0 %v325_v3 }
  0x8a   :  { %419 = vmatpush2.msra.mxu0 %v324_v4 }
  0x8b   :  { %420 = vmatprep.subr.mxu0 %v323_v5 }
  0x8c   :  { %421 = vmatpush2.msra.mxu0 %v322_v6  ;;  %v565_v6 = vld [vmem:[%s874_s8] ss:$0 sm:$0xff] }
  0x8d   :  { %422 = vmatprep.subr.mxu0 %v321_v7 }
  0x8e   :  { %423 = vmatpush2.msra.mxu0 %v320_v8 }
  0x8f   :  { %424 = vmatprep.subr.mxu0 %v319_v9 }
  0x90   :  { %425 = vmatpush2.msra.mxu0 %v318_v10 }
 0x110   :  { %v191_v37 = vpop.f32.mrf.mxu1 }
 0x112   :  { %v193_v41 = vpop.f32.mrf.mxu1 }
 0x114   :  { %v265_v42 = vpop.f32.mrf.mxu1 }
 0x115   :  { %v266_v44 = vadd.f32 %v265_v42, %v191_v37 }
 0x116   :  { %v267_v46 = vpop.f32.mrf.mxu1 }
 0x117   :  { %v268_v47 = vadd.f32 %v267_v46, %v193_v41  ;;  %v282_v48 = vadd.f32 %v275_v43, %v266_v44 }
 0x119   :  { %v283_v49 = vadd.f32 %v279_v45, %v268_v47  ;;  %v284_v51 = vmax.f32 %v282_v48, 0.0 }
 0x11b   :  { %v285_v50 = vmax.f32 %v283_v49, 0.0 }
 0x11d   :  { %426 = vmatprep.mubr.f32.mxu0 %v285_v50 }
 0x11e   :  { %427 = vmatmul.mubr.f32.vlgmr.msra.gmra.mxu0 %v284_v51 }
 0x1de   :  { %v428_v63 = vpop.f32.mrf.mxu0 }
 0x1df   :  { %v429_v0 = vadd.f32 %v428_v63, %v355_v61 }
 0x1e0   :  { %v430_v1 = vpop.f32.mrf.mxu0 }
 0x1e1   :  { %v431_v2 = vadd.f32 %v430_v1, %v359_v62  ;;  %v433_v4 = vmax.f32 %v429_v0, 0.0 }
 0x1e3   :  { %v434_v3 = vmax.f32 %v431_v2, 0.0 }
 0x1e5   :  { %538 = vmatprep.mubr.f32.mxu1 %v434_v3 }
 0x1e6   :  { %539 = vmatmul.mubr.f32.vlgmr.msra.gmra.mxu1 %v433_v4 }
 0x2a6   :  { %v598_v5 = vpop.f32.mrf.mxu1 }
 0x2a8   :  { %v599_v7 = vpop.f32.mrf.mxu1 }
 0x2a9   :  { %v600_v8 = vadd.f32 %v599_v7, %v598_v5 }
 0x2ab   :  { %v541_v9 = vadd.f32 %v600_v8, %v565_v6 }
 0x2ad   :  { %544 = vst [vmem:[#allocation13] sm:$0xff] %v541_v9 }
 0x2ae   :  { %744 = shalt.err (!%p741_p6)
}
 0x2af   :  { %554 = dma.vmem_to_hbm [thread:$0]  %s552_s22, 128, %s875_s9, [#allocation4]  }
 0x2b0   :  { %761 = dma.done.wait [#allocation4], 128  }
 0x2b1   :  { %762 = vsyncadd [#allocation4], 4294967168 }
 0x2b2   :  { %558 = vsyncpa [#allocation3], 1 }
 0x2b3   :  { %559 = vsyncpa [#allocation6], 1 }
 0x2b4   :  { %560 = vsyncpa [#allocation9], 1 }
 0x2b5   :  { %561 = vsyncpa [#allocation12], 1 }
 0x2b6   :  { %562 = vsyncpa [#allocation4], 1 }

</bundles_post_ra>
